<compile_context>
chip_gen: v7x
topology: tpu7x:2x2x1
jax: 0.10.0
libtpu: 0.0.40
codegen_flags: <defaults>
</compile_context>

<pallas_src>
import functools

import jax
import jax.numpy as jnp
from jax.experimental import pallas as pl
from jax.experimental.pallas import tpu as pltpu

IN_F, H0, H1, OUT_F = 30, 15, 5, 3
DEFAULT_TILE_B = 16384  # batch lanes per grid step; multiple of 128, ~1 MiB bf16 x-tile


def _round_up(n, m):
    return ((n + m - 1) // m) * m


def framint_kernel(x_ref, w0_ref, b0_ref, w1_ref, b1_ref, w2_ref, b2_ref, o_ref):
    # Transposed layout: x_ref [30, TILE_B] bf16, w_i [out_i, in_i] bf16,
    # b_i [out_i, 1] f32, o_ref [3, TILE_B] f32.
    # Computes  out = W2 @ tanh(W1 @ tanh(W0 @ x + b0) + b1) + b2.
    x = x_ref[...]

    # Layer 0: Linear(30 -> 15) + Tanh  (bf16 MXU operands, f32 accumulation)
    h = jnp.dot(w0_ref[...], x, preferred_element_type=jnp.float32)
    h = jnp.tanh(h + b0_ref[...])

    # Layer 1: Linear(15 -> 5) + Tanh
    h = jnp.dot(w1_ref[...], h.astype(jnp.bfloat16), preferred_element_type=jnp.float32)
    h = jnp.tanh(h + b1_ref[...])

    # Layer 2: Linear(5 -> 3), no activation
    out = jnp.dot(w2_ref[...], h.astype(jnp.bfloat16),
                  preferred_element_type=jnp.float32) + b2_ref[...]
    o_ref[...] = out.astype(o_ref.dtype)


@functools.partial(jax.jit, static_argnames=("tile_b",))
def framint_forward(x, params, *, tile_b=DEFAULT_TILE_B):
    """x: [B, 30] f32.  params: w_i [out, in] (PyTorch layout), b_i [out, 1].  Returns [B, 3]."""
    B = x.shape[0]
    # Lane-dense batch tile: multiple of 128, no larger than the (padded) batch.
    tile_b = min(tile_b, _round_up(B, 128))
    n_tiles = pl.cdiv(B, tile_b)
    b_pad = n_tiles * tile_b

    # [30, B_pad] bf16: features on sublanes, batch on lanes.  The bf16 cast
    # fuses into this transpose, halving its write traffic and the kernel's
    # x read traffic (the kernel already used bf16 MXU operands).
    x_t = jnp.pad(x.T.astype(jnp.bfloat16), ((0, 0), (0, b_pad - B)))
    w0 = params["w0"].astype(jnp.bfloat16)
    w1 = params["w1"].astype(jnp.bfloat16)
    w2 = params["w2"].astype(jnp.bfloat16)

    def const_spec(shape):
        # Resident across all batch tiles: DMA'd once, constant block index.
        return pl.BlockSpec(shape, lambda i: (0, 0))

    out_t = pl.pallas_call(
        framint_kernel,
        out_shape=jax.ShapeDtypeStruct((OUT_F, b_pad), jnp.float32),
        grid=(n_tiles,),
        in_specs=[
            pl.BlockSpec((IN_F, tile_b), lambda i: (0, i)),   # x tile, streamed
            const_spec((H0, IN_F)), const_spec((H0, 1)),       # w0, b0
            const_spec((H1, H0)),  const_spec((H1, 1)),        # w1, b1
            const_spec((OUT_F, H1)), const_spec((OUT_F, 1)),   # w2, b2
        ],
        out_specs=pl.BlockSpec((OUT_F, tile_b), lambda i: (0, i)),
        compiler_params=pltpu.CompilerParams(
            dimension_semantics=("parallel",)),                # shard tiles across TCs (v7x)
    )(x_t, w0, params["b0"], w1, params["b1"], w2, params["b2"])

    return out_t[:, :B].T


def init_params(key):
    """xavier_normal_ weights (PyTorch [out, in] layout), zero biases ([out, 1])."""
    dims = [(IN_F, H0), (H0, H1), (H1, OUT_F)]
    params = {}
    keys = jax.random.split(key, len(dims))
    for i, ((fan_in, fan_out), k) in enumerate(zip(dims, keys)):
        std = (2.0 / (fan_in + fan_out)) ** 0.5
        params[f"w{i}"] = std * jax.random.normal(k, (fan_out, fan_in), jnp.float32)
        params[f"b{i}"] = jnp.zeros((fan_out, 1), jnp.float32)
    return params


def framint_ref(x, params):
    """Pure-JAX f32 reference of the PyTorch forward pass."""
    h = jnp.tanh(x @ params["w0"].T + params["b0"][:, 0])
    h = jnp.tanh(h @ params["w1"].T + params["b1"][:, 0])
    return h @ params["w2"].T + params["b2"][:, 0]


if __name__ == "__main__":
    key = jax.random.PRNGKey(0)
    k_x, k_x2, k_p = jax.random.split(key, 3)
    params = init_params(k_p)

    # Small single-tile case.
    B = 8
    x = jax.random.normal(k_x, (B, IN_F), jnp.float32)
    out = jax.block_until_ready(framint_forward(x, params))
    ref = framint_ref(x, params)
    assert out.shape == (B, OUT_F), out.shape
    # bf16 MXU operands (f32 accumulation) -> loosened tolerance vs f32 reference.
    assert jnp.allclose(out, ref, atol=5e-2, rtol=5e-2), "mismatch vs reference (small)"

    # Multi-tile + ragged-tail case: forces grid > 1 and wrapper-side batch padding.
    B2 = 300
    x2 = jax.random.normal(k_x2, (B2, IN_F), jnp.float32)
    out2 = jax.block_until_ready(framint_forward(x2, params, tile_b=128))
    ref2 = framint_ref(x2, params)
    assert out2.shape == (B2, OUT_F), out2.shape
    assert jnp.allclose(out2, ref2, atol=5e-2, rtol=5e-2), "mismatch vs reference (tiled)"

    print("KERNEL_OK")
</pallas_src>

<mosaic_0001>
module attributes {stable_mosaic.version = 11 : i64} {
  func.func @framint_kernel(%arg0: i32, %arg1: memref<30x128xbf16, #tpu.memory_space<vmem>>, %arg2: memref<15x30xbf16, #tpu.memory_space<vmem>>, %arg3: memref<15x1xf32, #tpu.memory_space<vmem>>, %arg4: memref<5x15xbf16, #tpu.memory_space<vmem>>, %arg5: memref<5x1xf32, #tpu.memory_space<vmem>>, %arg6: memref<3x5xbf16, #tpu.memory_space<vmem>>, %arg7: memref<3x1xf32, #tpu.memory_space<vmem>>, %arg8: memref<3x128xf32, #tpu.memory_space<vmem>>) attributes {dimension_semantics = [#tpu.dimension_semantics<parallel>], iteration_bounds = array<i64: 1>, scalar_prefetch = 0 : i64, scratch_operands = 0 : i64, tpu.core_type = #tpu.core_type<tc>, window_params = [{transform_indices = @transform_0, window_bounds = array<i64: 30, 128>}, {pipeline_mode = #tpu.pipeline_mode<synchronous>, transform_indices = @transform_1, window_bounds = array<i64: 15, 30>}, {pipeline_mode = #tpu.pipeline_mode<synchronous>, transform_indices = @transform_2, window_bounds = array<i64: 15, 1>}, {pipeline_mode = #tpu.pipeline_mode<synchronous>, transform_indices = @transform_3, window_bounds = array<i64: 5, 15>}, {pipeline_mode = #tpu.pipeline_mode<synchronous>, transform_indices = @transform_4, window_bounds = array<i64: 5, 1>}, {pipeline_mode = #tpu.pipeline_mode<synchronous>, transform_indices = @transform_5, window_bounds = array<i64: 3, 5>}, {pipeline_mode = #tpu.pipeline_mode<synchronous>, transform_indices = @transform_6, window_bounds = array<i64: 3, 1>}, {transform_indices = @transform_7, window_bounds = array<i64: 3, 128>}]} {
    %c0 = arith.constant 0 : index
    %c0_0 = arith.constant 0 : index
    %0 = vector.load %arg1[%c0, %c0_0] : memref<30x128xbf16, #tpu.memory_space<vmem>>, vector<30x128xbf16>
    %c0_1 = arith.constant 0 : index
    %c0_2 = arith.constant 0 : index
    %1 = vector.load %arg2[%c0_1, %c0_2] : memref<15x30xbf16, #tpu.memory_space<vmem>>, vector<15x30xbf16>
    %cst = arith.constant dense<0.000000e+00> : vector<15x128xf32>
    %2 = tpu.matmul %1, %0, %cst {dimension_numbers = #tpu.dot_dimension_numbers<[1], [0], [0], [1], [0, 0, 1, 1], [], []>} : vector<15x30xbf16>, vector<30x128xbf16>, vector<15x128xf32> -> vector<15x128xf32>
    %c0_3 = arith.constant 0 : index
    %c0_4 = arith.constant 0 : index
    %3 = vector.load %arg3[%c0_3, %c0_4] : memref<15x1xf32, #tpu.memory_space<vmem>>, vector<15x1xf32>
    %4 = vector.broadcast %3 : vector<15x1xf32> to vector<15x128xf32>
    %5 = arith.addf %2, %4 : vector<15x128xf32>
    %6 = math.tanh %5 : vector<15x128xf32>
    %c0_5 = arith.constant 0 : index
    %c0_6 = arith.constant 0 : index
    %7 = vector.load %arg4[%c0_5, %c0_6] : memref<5x15xbf16, #tpu.memory_space<vmem>>, vector<5x15xbf16>
    %8 = arith.truncf %6 : vector<15x128xf32> to vector<15x128xbf16>
    %cst_7 = arith.constant dense<0.000000e+00> : vector<5x128xf32>
    %9 = tpu.matmul %7, %8, %cst_7 {dimension_numbers = #tpu.dot_dimension_numbers<[1], [0], [0], [1], [0, 0, 1, 1], [], []>} : vector<5x15xbf16>, vector<15x128xbf16>, vector<5x128xf32> -> vector<5x128xf32>
    %c0_8 = arith.constant 0 : index
    %c0_9 = arith.constant 0 : index
    %10 = vector.load %arg5[%c0_8, %c0_9] : memref<5x1xf32, #tpu.memory_space<vmem>>, vector<5x1xf32>
    %11 = vector.broadcast %10 : vector<5x1xf32> to vector<5x128xf32>
    %12 = arith.addf %9, %11 : vector<5x128xf32>
    %13 = math.tanh %12 : vector<5x128xf32>
    %c0_10 = arith.constant 0 : index
    %c0_11 = arith.constant 0 : index
    %14 = vector.load %arg6[%c0_10, %c0_11] : memref<3x5xbf16, #tpu.memory_space<vmem>>, vector<3x5xbf16>
    %15 = arith.truncf %13 : vector<5x128xf32> to vector<5x128xbf16>
    %cst_12 = arith.constant dense<0.000000e+00> : vector<3x128xf32>
    %16 = tpu.matmul %14, %15, %cst_12 {dimension_numbers = #tpu.dot_dimension_numbers<[1], [0], [0], [1], [0, 0, 1, 1], [], []>} : vector<3x5xbf16>, vector<5x128xbf16>, vector<3x128xf32> -> vector<3x128xf32>
    %c0_13 = arith.constant 0 : index
    %c0_14 = arith.constant 0 : index
    %17 = vector.load %arg7[%c0_13, %c0_14] : memref<3x1xf32, #tpu.memory_space<vmem>>, vector<3x1xf32>
    %18 = vector.broadcast %17 : vector<3x1xf32> to vector<3x128xf32>
    %19 = arith.addf %16, %18 : vector<3x128xf32>
    %c0_15 = arith.constant 0 : index
    %c0_16 = arith.constant 0 : index
    %20 = vector.load %arg8[%c0_15, %c0_16] : memref<3x128xf32, #tpu.memory_space<vmem>>, vector<3x128xf32>
    tpu.vector_store %arg8[%c0_15, %c0_16], %19 {strides = array<i32>} : memref<3x128xf32, #tpu.memory_space<vmem>>, vector<3x128xf32>,
    return
  }
  func.func @transform_0(%arg0: i32) -> (i32, i32) {
    %c0_i32 = arith.constant 0 : i32
    %c0_i32_0 = arith.constant 0 : i32
    return %c0_i32, %arg0 : i32, i32
  }
  func.func @transform_1(%arg0: i32) -> (i32, i32) {
    %c0_i32 = arith.constant 0 : i32
    %c0_i32_0 = arith.constant 0 : i32
    %c0_i32_1 = arith.constant 0 : i32
    return %c0_i32, %c0_i32_0 : i32, i32
  }
  func.func @transform_2(%arg0: i32) -> (i32, i32) {
    %c0_i32 = arith.constant 0 : i32
    %c0_i32_0 = arith.constant 0 : i32
    %c0_i32_1 = arith.constant 0 : i32
    return %c0_i32, %c0_i32_0 : i32, i32
  }
  func.func @transform_3(%arg0: i32) -> (i32, i32) {
    %c0_i32 = arith.constant 0 : i32
    %c0_i32_0 = arith.constant 0 : i32
    %c0_i32_1 = arith.constant 0 : i32
    return %c0_i32, %c0_i32_0 : i32, i32
  }
  func.func @transform_4(%arg0: i32) -> (i32, i32) {
    %c0_i32 = arith.constant 0 : i32
    %c0_i32_0 = arith.constant 0 : i32
    %c0_i32_1 = arith.constant 0 : i32
    return %c0_i32, %c0_i32_0 : i32, i32
  }
  func.func @transform_5(%arg0: i32) -> (i32, i32) {
    %c0_i32 = arith.constant 0 : i32
    %c0_i32_0 = arith.constant 0 : i32
    %c0_i32_1 = arith.constant 0 : i32
    return %c0_i32, %c0_i32_0 : i32, i32
  }
  func.func @transform_6(%arg0: i32) -> (i32, i32) {
    %c0_i32 = arith.constant 0 : i32
    %c0_i32_0 = arith.constant 0 : i32
    %c0_i32_1 = arith.constant 0 : i32
    return %c0_i32, %c0_i32_0 : i32, i32
  }
  func.func @transform_7(%arg0: i32) -> (i32, i32) {
    %c0_i32 = arith.constant 0 : i32
    %c0_i32_0 = arith.constant 0 : i32
    return %c0_i32, %arg0 : i32, i32
  }
}

</mosaic_0001>

<bundles_post_ra>
// kernel: framint_forward.1
= control target key start
LH: loop header
LB: loop body
LE: loop exit
PB: predicated region body
PF: predicated region fallthrough
CT: control target
= control target key end

     0   :  { %vm65_vm0 = vcmask 1046528   ;;  %v283_v0 = vmov 0.0   ;;  %vm284_vm1 = vmmov 0   ;;  %v285_v3 = vmov 0   ;;  %s362_s0 = inlined_call_operand.vmem [shape: bf16[30,128], index: 0, kind: input, shape index: {}]   ;;  %s363_s2 = inlined_call_operand.vmem [shape: f32[15,1], index: 2, kind: input, shape index: {}]   ;;  %s364_s1 = inlined_call_operand.vmem [shape: bf16[15,30], index: 1, kind: input, shape index: {}]   ;;  %s365_s4 = inlined_call_operand.vmem [shape: f32[5,1], index: 4, kind: input, shape index: {}]   ;;  %s366_s6 = inlined_call_operand.vmem [shape: f32[3,1], index: 6, kind: input, shape index: {}]   ;;  %s367_s3 = inlined_call_operand.vmem [shape: bf16[5,15], index: 3, kind: input, shape index: {}]   ;;  %s368_s5 = inlined_call_operand.vmem [shape: bf16[3,5], index: 5, kind: input, shape index: {}]   ;;  %s369_s7 = inlined_call_operand.vmem [shape: f32[3,128], index: 7, kind: output, shape index: {}]  }
   0x1   :  { %248 = vmatprep.subr.bf16.mxu0 %v283_v0  ;;  %v274_v1 = vld [vmem:[%s362_s0] sm:$0xff]   ;;  %252 = vmatprep.mubr.msk.bf16.mxu0 %vm284_vm1, %v283_v0  ;;  %v275_v2 = vld [vmem:[%s362_s0 + $0x8] sm:$0x7f]   ;;  %vm61_vm2 = vcmask 244736   ;;  %vm124_vm3 = vcmask 1047552   ;;  %v286_v18 = vmov 65535  }
   0x2   :  { %272 = vset.pattern.permute.xlu0 %v285_v3  ;;  %256 = vmatprep.subr.bf16.mxu1 %v283_v0  ;;  %v67_v4 = vsel %vm65_vm0, %v275_v2, 0  ;;  %v33_v5 = vld [vmem:[%s363_s2] sm:$0xff]  ;;  %v34_v7 = vld [vmem:[%s363_s2 + $0x8] sm:$0x7f]  ;;  %v125_v19 = vsel %vm65_vm0, 4294967295, %v286_v18  ;;  %vm120_vm4 = vcmask 121856  }
   0x3   :  { %249 = vmatpush3.bf16.msra.mxu0 %v274_v1  ;;  %258 = vmatprep.mubr.msk.bf16.mxu1 %vm284_vm1, %v283_v0  ;;  %v276_v6 = vld [vmem:[%s364_s1] sm:$0xff]   ;;  %v126_v22 = vsel %vm124_vm3, %v125_v19, 0  ;;  %vm183_vm5 = vcmask 1041408   ;;  %vm184_vm6 = vcmask 1042432   ;;  %vm179_vm7 = vcmask 39936  }
   0x4   :  { %250 = vmatprep.subr.bf16.mxu0 %v283_v0  ;;  %273 = vset.pattern.permute.xlu1 %v285_v3  ;;  %v114_v8 = vld [vmem:[%s365_s4] sm:$0x1f]  ;;  %v185_v32 = vsel %vm183_vm5, 4294967295, %v286_v18 }
   0x5   :  { %37 = vperm.xlu0 %272, %v33_v5   ;;  %117 = vperm.xlu1 %273, %v114_v8   ;;  %v173_v9 = vld [vmem:[%s366_s6] sm:$0x7]  ;;  %v186_v34 = vsel %vm184_vm6, %v185_v32, 0 }
   0x6   :  { %v112_v25 = vld [vmem:[%s367_s3] sm:$0x7] }
   0x7   :  { %251 = vmatpush3.bf16.msra.mxu0 %v67_v4  ;;  %v171_v37 = vld [vmem:[%s368_s5] sm:$0x3] }
   0x9   :  { %42 = vperm.xlu0 %272, %v34_v7   ;;  %176 = vperm.xlu1 %273, %v173_v9  }
   0xa   :  { %253 = vmatmul.mubr.msk.bf16.vlgmr.msra.gmra.mrb[0].mxu0 %vm61_vm2, %v276_v6 }
  0x84   :  { %v38_v10 = vpop.permute.xlu0 %37  ;;  %v118_v26 = vpop.permute.xlu1 %117 }
  0x88   :  { %v43_v14 = vpop.permute.xlu0 %42  ;;  %v177_v38 = vpop.permute.xlu1 %176 }
  0xdd   :  { %v103_v11 = vpop.f32.mrb[0].mxu0 }
  0xde   :  { %v104_v12 = vadd.f32 %v103_v11, %v38_v10  ;;  %v254_v13 = vpop.f32.mrb[1].mxu0 }
  0xdf   :  { %v106_v15 = vpop.f32.mrb[2].mxu0 }
  0xe0   :  { %v107_v16 = vadd.f32 %v106_v15, %v43_v14  ;;  %v255_v17 = vpop.f32.mrb[3].mxu0  ;;  %277 = vtanh.f32 %v104_v12 }
  0xe2   :  { %279 = vtanh.f32 %v107_v16 }
  0xea   :  { %v278_v20 = vpop.eup %277 }
  0xec   :  { %v280_v21 = vpop.eup %279 }
  0xed   :  { %v113_v23 = vpack.c.bf16 %v280_v21, %v278_v20 }
  0xef   :  { %v128_v24 = vand.u32 %v126_v22, %v113_v23 }
  0xf1   :  { %257 = vmatpush3.bf16.msra.mxu1 %v128_v24 }
  0xf2   :  { %262 = vmatprep.subr.bf16.mxu1 %v283_v0 }
  0xf4   :  { %259 = vmatmul.mubr.msk.bf16.vlgmr.msra.gmra.mrb[0].mxu1 %vm120_vm4, %v112_v25 }
  0xf5   :  { %264 = vmatprep.mubr.msk.bf16.mxu1 %vm284_vm1, %v283_v0 }
 0x1c7   :  { %v164_v27 = vpop.f32.mrb[0].mxu1 }
 0x1c8   :  { %v165_v28 = vadd.f32 %v164_v27, %v118_v26  ;;  %v260_v29 = vpop.f32.mrb[1].mxu1 }
 0x1c9   :  { %v167_v30 = vpop.f32.mrb[2].mxu1 }
 0x1ca   :  { %281 = vtanh.f32 %v165_v28  ;;  %v261_v31 = vpop.f32.mrb[3].mxu1 }
 0x1d4   :  { %v282_v33 = vpop.eup %281 }
 0x1d5   :  { %v172_v35 = vpack.c.bf16 %v282_v33, %v282_v33 }
 0x1d7   :  { %v188_v36 = vand.u32 %v186_v34, %v172_v35 }
 0x1d9   :  { %263 = vmatpush3.bf16.msra.mxu1 %v188_v36 }
 0x1dc   :  { %265 = vmatmul.mubr.msk.bf16.vlgmr.msra.gmra.mrb[4].mxu1 %vm179_vm7, %v171_v37 }
 0x2af   :  { %v224_v39 = vpop.f32.mrb[4].mxu1 }
 0x2b0   :  { %v225_v40 = vadd.f32 %v224_v39, %v177_v38  ;;  %v266_v41 = vpop.f32.mrb[5].mxu1 }
 0x2b1   :  { %v227_v42 = vpop.f32.mrb[6].mxu1 }
 0x2b2   :  { %230 = vst [vmem:[%s369_s7] sm:$0x7] %v225_v40  ;;  %v267_v43 = vpop.f32.mrb[7].mxu1 }

</bundles_post_ra>
